<compile_context>
chip_gen: v6e
topology: v6e:2x2x1
jax: 0.10.0
libtpu: 0.0.40
codegen_flags: <defaults>
</compile_context>

<pallas_src>
import functools

import jax
import jax.numpy as jnp
from jax.experimental import pallas as pl
from jax.experimental.pallas import tpu as pltpu


# ---------------------------------------------------------------------------
# small helpers
# ---------------------------------------------------------------------------
def _round_up(a, b):
    return (a + b - 1) // b * b


def _divisors_desc(n):
    return [d for d in range(n, 0, -1) if n % d == 0]


def _tpu_generation():
    try:
        kind = jax.devices()[0].device_kind.lower()
    except Exception:
        return 6
    for g in (7, 6, 5, 4):
        if str(g) in kind:
            return g
    return 6


def _vmem_capacity_bytes():
    try:
        info = pltpu.get_tpu_info()
        for name in ("vmem_capacity_bytes", "vmem_bytes", "vmem_size_bytes"):
            v = getattr(info, name, None)
            if v:
                return int(v)
    except Exception:
        pass
    return (64 << 20) if _tpu_generation() >= 7 else (128 << 20)


def _vmem_limit_target():
    cap = _vmem_capacity_bytes()
    # v7x (64 MiB physical): ~54 MiB scoped limit; v5e/v6e (128 MiB): ~108 MiB.
    return cap, min(int(cap * 0.85), cap - (8 << 20))


# ---------------------------------------------------------------------------
# Pallas kernels
# ---------------------------------------------------------------------------
def _conv3x3s2_kernel(a_ref, b_ref, w_ref, bias_ref, o_ref):
    """3x3 stride-2 conv, 9-tap in-kernel accumulation.

    a_ref   : (TH, 4, Wq, C)  row tile; dim1 = 2*h_parity + w_parity of the
              input laid out so that a[p, 2*hp+wp, q, c] == xpad[2*(ho)+hp, 2*q+wp, c]
    b_ref   : (1, 2, Wq, C)   even row of the h-pair just after this tile
              (supplies the kh=2 tap of the tile's last output row)
    w_ref   : (9, C, TCO)     tap-major (kh*3+kw) weights for this Cout tile
    bias_ref: (1, TCO) f32
    o_ref   : (TH, Wo, TCO)
    """
    TH = a_ref.shape[0]
    Wo, TCO = o_ref.shape[1], o_ref.shape[2]
    C = a_ref.shape[3]

    a = a_ref[...]
    if TH > 1:
        rows2 = jnp.concatenate([a[1:, 0:2], b_ref[...]], axis=0)
    else:
        rows2 = b_ref[...]
    # rows[kh]: (TH, 2, Wq, C) with dim1 = w parity, giving padded row 2*ho+kh
    rows = (a[:, 0:2], a[:, 2:4], rows2)

    acc = jnp.zeros((TH * Wo, TCO), jnp.float32)
    kw_sel = ((0, 0), (1, 0), (0, 1))        # kw -> (w parity, w-pair offset)
    for kh in range(3):
        r = rows[kh]
        for kw in range(3):
            wp, off = kw_sel[kw]
            t = r[:, wp, off:off + Wo, :].reshape(TH * Wo, C)
            acc = acc + jnp.dot(t, w_ref[kh * 3 + kw],
                                preferred_element_type=jnp.float32)
    acc = acc + bias_ref[...]
    o_ref[...] = acc.reshape(TH, Wo, TCO).astype(o_ref.dtype)


def _avgpool2x2_kernel(x_ref, pw_ref, o_ref):
    """avg_pool2d(k=2, s=2) in native NCHW layout.

    x_ref : (TB, TH, 2*W2)  -- lanes [0:W2) = even input row, [W2:2*W2) = odd row
    pw_ref: (W2, Wh) f32    -- 0.25 at (2j, j) and (2j+1, j)
    o_ref : (TB, TH, Wh)
    """
    tb, th, _ = x_ref.shape
    w2 = pw_ref.shape[0]
    x = x_ref[...].astype(jnp.float32)
    s = x[:, :, :w2] + x[:, :, w2:]                       # H-pair sum (contiguous lane slices)
    y = jnp.dot(s.reshape(tb * th, w2), pw_ref[...],
                preferred_element_type=jnp.float32)        # 0.25 * W-pair sum
    o_ref[...] = y.reshape(tb, th, -1).astype(o_ref.dtype)


# ---------------------------------------------------------------------------
# with_conv=True path
# ---------------------------------------------------------------------------
@functools.partial(jax.jit, static_argnames=("mxu_dtype",))
def downsample_with_conv(x_nchw, weight_oihw, bias, *, mxu_dtype=None):
    """x_nchw: [N,C,H,W], weight: [Cout,C,3,3], bias: [Cout] -> [N,Cout,Ho,Wo].

    mxu_dtype=jnp.bfloat16 feeds the MXU in bf16 with f32 accumulation
    (recommended on v5e); default keeps the input dtype (bit-faithful f32).
    """
    N, C, H, W = x_nchw.shape
    Cout = int(weight_oihw.shape[0])
    assert weight_oihw.shape == (Cout, C, 3, 3)
    out_dtype = x_nchw.dtype

    Ho = (H - 2) // 2 + 1
    Wo = (W - 2) // 2 + 1
    HP, Wq = Ho + 1, Wo + 1                 # h-pairs / w-pairs incl. the pad pair

    # Single fused pad+reshape+transpose pass (replaces the old HBM im2col):
    # xq[n, p, 2*hp+wp, q, c] == xpad_nchw[n, c, 2p+hp, 2q+wp]
    pad_h = 2 * HP - H
    pad_w = 2 * Wq - W
    xp = jnp.pad(x_nchw, ((0, 0), (0, 0), (0, pad_h), (0, pad_w)))
    xq = jnp.transpose(xp.reshape(N, C, HP, 2, Wq, 2), (0, 2, 3, 5, 4, 1))
    xq = xq.reshape(N, HP, 4, Wq, C)

    # tap-major weights (kh*3+kw, ci, co), Cout padded lane-dense (256 on v6e/v7x tiles)
    Coutp = _round_up(Cout, 256) if Cout > 128 else _round_up(Cout, 128)
    wts = jnp.transpose(weight_oihw, (2, 3, 1, 0)).reshape(9, C, Cout)
    if Coutp > Cout:
        wts = jnp.pad(wts, ((0, 0), (0, 0), (0, Coutp - Cout)))
        b2 = jnp.pad(bias, (0, Coutp - Cout))
    else:
        b2 = bias
    b2 = b2.reshape(1, Coutp).astype(jnp.float32)

    if mxu_dtype is not None:
        xq = xq.astype(mxu_dtype)
        wts = wts.astype(mxu_dtype)

    in_isz = jnp.dtype(xq.dtype).itemsize
    out_isz = jnp.dtype(out_dtype).itemsize

    cap, limit_target = _vmem_limit_target()

    # Cout tile (keeps streamed weight blocks bounded for large C / Cout).
    if Coutp <= 512:
        TCO = Coutp
    elif Coutp % 512 == 0:
        TCO = 512
    else:
        TCO = 256
    while TCO > 128 and 18 * C * TCO * in_isz > limit_target // 3 and Coutp % (TCO // 2) == 0:
        TCO //= 2
    n_j = Coutp // TCO

    # --- VMEM budgeting (accounts for (8,128) tile padding) ---
    Cp_lane = _round_up(C, 128)
    Wq_sub = _round_up(Wq, 8)
    Wo_sub = _round_up(Wo, 8)
    resident = 2 * 9 * _round_up(C, 8) * TCO * in_isz + 2 * 8 * TCO * 4  # weights + bias (dbl buf)
    b_blk = 2 * (2 * Wq_sub * Cp_lane * in_isz)                           # boundary-row buffers

    def _tile_bytes(th):
        a_blk = th * 4 * Wq_sub * Cp_lane * in_isz
        o_blk = th * Wo_sub * TCO * out_isz
        acc = th * Wo_sub * TCO * 4
        return 2 * a_blk + 2 * o_blk + 2 * acc + 3 * a_blk   # dbl buffers + value temporaries

    budget = limit_target - resident - b_blk - (6 << 20)
    TH = 1
    for th in _divisors_desc(Ho):
        if _tile_bytes(th) <= budget:
            TH = th
            break
    # TODO(synk): for extreme C*W where even TH=1 row blocks exceed VMEM, also tile W / stream taps.

    need_total = _tile_bytes(TH) + resident + b_blk + (6 << 20)
    vmem_limit = int(min(cap - (4 << 20), max(need_total + (8 << 20), 32 << 20)))

    grid = (N, n_j, Ho // TH)

    a_spec = pl.BlockSpec((pl.Squeezed(), TH, 4, Wq, C),
                          lambda n, j, i: (n, i, 0, 0, 0))
    bnd_spec = pl.BlockSpec((pl.Squeezed(), 1, 2, Wq, C),
                            lambda n, j, i: (n, (i + 1) * TH, 0, 0, 0))
    w_spec = pl.BlockSpec((9, C, TCO), lambda n, j, i: (0, 0, j))
    bias_spec = pl.BlockSpec((1, TCO), lambda n, j, i: (0, j))
    o_spec = pl.BlockSpec((pl.Squeezed(), TH, Wo, TCO),
                          lambda n, j, i: (n, i, 0, j))

    cost = pl.CostEstimate(
        flops=int(2 * N * Ho * Wo * 9 * C * Coutp),
        transcendentals=0,
        bytes_accessed=int(xq.size * in_isz * (1 + 1.0 / max(TH, 1))
                           + 9 * C * Coutp * in_isz * N * n_j
                           + N * Ho * Wo * Coutp * out_isz),
    )

    out = pl.pallas_call(
        _conv3x3s2_kernel,
        out_shape=jax.ShapeDtypeStruct((N, Ho, Wo, Coutp), out_dtype),
        grid=grid,
        in_specs=[a_spec, bnd_spec, w_spec, bias_spec],
        out_specs=o_spec,
        compiler_params=pltpu.CompilerParams(
            dimension_semantics=("parallel", "parallel", "parallel"),
            vmem_limit_bytes=vmem_limit),
        cost_estimate=cost,
    )(xq, xq, wts, b2)

    if Coutp > Cout:
        out = out[..., :Cout]
    return jnp.transpose(out, (0, 3, 1, 2))          # back to NCHW


# ---------------------------------------------------------------------------
# with_conv=False path (avg_pool2d k=2, s=2) -- native NCHW, no transposes
# ---------------------------------------------------------------------------
@jax.jit
def downsample_no_conv(x_nchw):
    N, C, H, W = x_nchw.shape
    Hh, Wh = H // 2, W // 2                 # avg_pool2d floors odd H/W
    H2, W2 = 2 * Hh, 2 * Wh
    dtype = x_nchw.dtype

    x = x_nchw
    if H2 != H or W2 != W:
        x = x[:, :, :H2, :W2]
    NC = N * C
    # Free row-major reshape: lanes [0:W2) = even row of the pair, [W2:2W2) = odd row.
    x3 = x.reshape(NC, Hh, 2 * W2)

    # 0.25-valued W-pooling matrix: pw[w, w//2] = 0.25
    cols = jnp.arange(W2) // 2
    pw = (jnp.arange(Wh)[None, :] == cols[:, None]).astype(jnp.float32) * 0.25

    isz = jnp.dtype(dtype).itemsize
    cap, limit_target = _vmem_limit_target()
    block_target = min(16 << 20, max(4 << 20, (limit_target - (8 << 20)) // 6))

    def _blk_bytes(tb, th):
        thp = _round_up(th, 8)
        inb = tb * thp * _round_up(2 * W2, 128) * isz
        outb = tb * thp * _round_up(Wh, 128) * isz
        tmp = tb * thp * (_round_up(W2, 128) + _round_up(Wh, 128)) * 4
        return 2 * inb + 2 * outb + tmp

    # TH must be a multiple of 8 (or the full Hh) for the (TH, 2*W2)/(TH, Wh) blocks.
    th_cands = [d for d in _divisors_desc(Hh) if d % 8 == 0 or d == Hh]
    TH = th_cands[-1]
    for th in th_cands:
        if _blk_bytes(1, th) <= block_target:
            TH = th
            break
    TB = 1
    for tb in _divisors_desc(NC):
        if _blk_bytes(tb, TH) <= block_target:
            TB = tb
            break

    need = _blk_bytes(TB, TH) + 2 * _round_up(W2, 8) * _round_up(Wh, 128) * 4 + (6 << 20)
    vmem_limit = int(min(cap - (4 << 20), max(need + (8 << 20), 32 << 20)))

    cost = pl.CostEstimate(
        flops=int(2 * NC * Hh * W2 * Wh + NC * Hh * W2),
        transcendentals=0,
        bytes_accessed=int(NC * Hh * 2 * W2 * isz + W2 * Wh * 4 + NC * Hh * Wh * isz),
    )

    out = pl.pallas_call(
        _avgpool2x2_kernel,
        out_shape=jax.ShapeDtypeStruct((NC, Hh, Wh), dtype),
        grid=(NC // TB, Hh // TH),
        in_specs=[pl.BlockSpec((TB, TH, 2 * W2), lambda b, i: (b, i, 0)),
                  pl.BlockSpec((W2, Wh), lambda b, i: (0, 0))],
        out_specs=pl.BlockSpec((TB, TH, Wh), lambda b, i: (b, i, 0)),
        compiler_params=pltpu.CompilerParams(
            dimension_semantics=("parallel", "parallel"),
            vmem_limit_bytes=vmem_limit),
        cost_estimate=cost,
    )(x3, pw)

    return out.reshape(N, C, Hh, Wh)


# ---------------------------------------------------------------------------
# Main: deterministic params, small shapes, reference checks
# ---------------------------------------------------------------------------
def _conv_reference(x, weight, bias):
    xp = jnp.pad(x, ((0, 0), (0, 0), (0, 1), (0, 1)))
    y = jax.lax.conv_general_dilated(
        xp, weight, window_strides=(2, 2), padding="VALID",
        dimension_numbers=("NCHW", "OIHW", "NCHW"))
    return y + bias.reshape(1, -1, 1, 1)


if __name__ == "__main__":
    key = jax.random.PRNGKey(0)
    kx, kw, kb, kx2, kw2, kb2 = jax.random.split(key, 6)

    # --- with_conv=True, even spatial dims (module default shapes) ---
    N, C, H, W = 2, 4, 16, 16
    x = jax.random.normal(kx, (N, C, H, W), dtype=jnp.float32)
    weight = 0.1 * jax.random.normal(kw, (C, C, 3, 3), dtype=jnp.float32)
    bias = 0.1 * jax.random.normal(kb, (C,), dtype=jnp.float32)

    y_conv = jax.block_until_ready(downsample_with_conv(x, weight, bias))
    y_ref = _conv_reference(x, weight, bias)
    assert y_conv.shape == (N, C, 8, 8), y_conv.shape
    assert jnp.allclose(y_conv, y_ref, rtol=1e-4, atol=1e-4), (
        float(jnp.max(jnp.abs(y_conv - y_ref))))

    # --- with_conv=True (bf16 MXU feed, f32 accumulation) ---
    y_bf16 = jax.block_until_ready(
        downsample_with_conv(x, weight, bias, mxu_dtype=jnp.bfloat16))
    assert jnp.allclose(y_bf16, y_ref, rtol=5e-2, atol=5e-2), (
        float(jnp.max(jnp.abs(y_bf16 - y_ref))))

    # --- with_conv=True, odd / rectangular spatial dims ---
    x2 = jax.random.normal(kx2, (1, 8, 15, 20), dtype=jnp.float32)
    w2 = 0.1 * jax.random.normal(kw2, (8, 8, 3, 3), dtype=jnp.float32)
    b2 = 0.1 * jax.random.normal(kb2, (8,), dtype=jnp.float32)
    y2 = jax.block_until_ready(downsample_with_conv(x2, w2, b2))
    y2_ref = _conv_reference(x2, w2, b2)
    assert y2.shape == y2_ref.shape, (y2.shape, y2_ref.shape)
    assert jnp.allclose(y2, y2_ref, rtol=1e-4, atol=1e-4), (
        float(jnp.max(jnp.abs(y2 - y2_ref))))

    # --- with_conv=False ---
    y_pool = jax.block_until_ready(downsample_no_conv(x))
    y_pool_ref = x.reshape(N, C, 8, 2, 8, 2).mean(axis=(3, 5))
    assert y_pool.shape == (N, C, 8, 8), y_pool.shape
    assert jnp.allclose(y_pool, y_pool_ref, rtol=1e-5, atol=1e-5)

    xo = jax.random.normal(kx2, (2, 3, 15, 18), dtype=jnp.float32)
    ypo = jax.block_until_ready(downsample_no_conv(xo))
    ypo_ref = xo[:, :, :14, :18].reshape(2, 3, 7, 2, 9, 2).mean(axis=(3, 5))
    assert ypo.shape == (2, 3, 7, 9), ypo.shape
    assert jnp.allclose(ypo, ypo_ref, rtol=1e-5, atol=1e-5)

    print("KERNEL_OK")
</pallas_src>

<mosaic_0001>
module attributes {stable_mosaic.version = 11 : i64} {
  func.func @_conv3x3s2_kernel(%arg0: i32, %arg1: i32, %arg2: i32, %arg3: memref<1x8x4x9x4xf32, #tpu.memory_space<vmem>>, %arg4: memref<1x1x2x9x4xf32, #tpu.memory_space<vmem>>, %arg5: memref<9x4x128xf32, #tpu.memory_space<vmem>>, %arg6: memref<1x128xf32, #tpu.memory_space<vmem>>, %arg7: memref<1x8x8x128xf32, #tpu.memory_space<vmem>>) attributes {dimension_semantics = [#tpu.dimension_semantics<parallel>, #tpu.dimension_semantics<parallel>, #tpu.dimension_semantics<parallel>], iteration_bounds = array<i64: 2, 1, 1>, scalar_prefetch = 0 : i64, scratch_operands = 0 : i64, tpu.core_type = #tpu.core_type<tc>, window_params = [{transform_indices = @transform_0, window_bounds = array<i64: 1, 8, 4, 9, 4>}, {transform_indices = @transform_1, window_bounds = array<i64: 1, 1, 2, 9, 4>}, {transform_indices = @transform_2, window_bounds = array<i64: 9, 4, 128>}, {transform_indices = @transform_3, window_bounds = array<i64: 1, 128>}, {transform_indices = @transform_4, window_bounds = array<i64: 1, 8, 8, 128>}]} {
    %c0 = arith.constant 0 : index
    %c0_0 = arith.constant 0 : index
    %c0_1 = arith.constant 0 : index
    %c0_2 = arith.constant 0 : index
    %c0_3 = arith.constant 0 : index
    %0 = vector.load %arg3[%c0, %c0_0, %c0_1, %c0_2, %c0_3] : memref<1x8x4x9x4xf32, #tpu.memory_space<vmem>>, vector<1x8x4x9x4xf32>
    %1 = vector.shape_cast %0 : vector<1x8x4x9x4xf32> to vector<8x4x9x4xf32>
    %2 = vector.extract_strided_slice %1 {offsets = [1, 0, 0, 0], sizes = [7, 2, 9, 4], strides = [1, 1, 1, 1]} : vector<8x4x9x4xf32> to vector<7x2x9x4xf32>
    %c0_4 = arith.constant 0 : index
    %c0_5 = arith.constant 0 : index
    %c0_6 = arith.constant 0 : index
    %c0_7 = arith.constant 0 : index
    %c0_8 = arith.constant 0 : index
    %3 = vector.load %arg4[%c0_4, %c0_5, %c0_6, %c0_7, %c0_8] : memref<1x1x2x9x4xf32, #tpu.memory_space<vmem>>, vector<1x1x2x9x4xf32>
    %4 = vector.shape_cast %3 : vector<1x1x2x9x4xf32> to vector<1x2x9x4xf32>
    %5 = tpu.concatenate %2, %4 in 0 : vector<7x2x9x4xf32>, vector<1x2x9x4xf32> -> vector<8x2x9x4xf32>
    %6 = vector.extract_strided_slice %1 {offsets = [0, 0, 0, 0], sizes = [8, 2, 9, 4], strides = [1, 1, 1, 1]} : vector<8x4x9x4xf32> to vector<8x2x9x4xf32>
    %7 = vector.extract_strided_slice %1 {offsets = [0, 2, 0, 0], sizes = [8, 2, 9, 4], strides = [1, 1, 1, 1]} : vector<8x4x9x4xf32> to vector<8x2x9x4xf32>
    %cst = arith.constant 0.000000e+00 : f32
    %8 = vector.broadcast %cst : f32 to vector<64x128xf32>
    %9 = vector.extract_strided_slice %6 {offsets = [0, 0, 0, 0], sizes = [8, 1, 8, 4], strides = [1, 1, 1, 1]} : vector<8x2x9x4xf32> to vector<8x1x8x4xf32>
    %10 = vector.shape_cast %9 : vector<8x1x8x4xf32> to vector<8x8x4xf32>
    %11 = vector.shape_cast %10 : vector<8x8x4xf32> to vector<64x4xf32>
    %c0_9 = arith.constant 0 : index
    %c0_10 = arith.constant 0 : index
    %c0_11 = arith.constant 0 : index
    %12 = vector.load %arg5[%c0_9, %c0_10, %c0_11] : memref<9x4x128xf32, #tpu.memory_space<vmem>>, vector<1x4x128xf32>
    %13 = vector.shape_cast %12 : vector<1x4x128xf32> to vector<4x128xf32>
    %cst_12 = arith.constant dense<0.000000e+00> : vector<64x128xf32>
    %14 = tpu.matmul %11, %13, %cst_12 {dimension_numbers = #tpu.dot_dimension_numbers<[1], [0], [0], [1], [0, 0, 1, 1], [], []>} : vector<64x4xf32>, vector<4x128xf32>, vector<64x128xf32> -> vector<64x128xf32>
    %15 = arith.addf %8, %14 : vector<64x128xf32>
    %16 = vector.extract_strided_slice %6 {offsets = [0, 1, 0, 0], sizes = [8, 1, 8, 4], strides = [1, 1, 1, 1]} : vector<8x2x9x4xf32> to vector<8x1x8x4xf32>
    %17 = vector.shape_cast %16 : vector<8x1x8x4xf32> to vector<8x8x4xf32>
    %18 = vector.shape_cast %17 : vector<8x8x4xf32> to vector<64x4xf32>
    %c1 = arith.constant 1 : index
    %c0_13 = arith.constant 0 : index
    %c0_14 = arith.constant 0 : index
    %19 = vector.load %arg5[%c1, %c0_13, %c0_14] : memref<9x4x128xf32, #tpu.memory_space<vmem>>, vector<1x4x128xf32>
    %20 = vector.shape_cast %19 : vector<1x4x128xf32> to vector<4x128xf32>
    %cst_15 = arith.constant dense<0.000000e+00> : vector<64x128xf32>
    %21 = tpu.matmul %18, %20, %cst_15 {dimension_numbers = #tpu.dot_dimension_numbers<[1], [0], [0], [1], [0, 0, 1, 1], [], []>} : vector<64x4xf32>, vector<4x128xf32>, vector<64x128xf32> -> vector<64x128xf32>
    %22 = arith.addf %15, %21 : vector<64x128xf32>
    %23 = vector.extract_strided_slice %6 {offsets = [0, 0, 1, 0], sizes = [8, 1, 8, 4], strides = [1, 1, 1, 1]} : vector<8x2x9x4xf32> to vector<8x1x8x4xf32>
    %24 = vector.shape_cast %23 : vector<8x1x8x4xf32> to vector<8x8x4xf32>
    %25 = vector.shape_cast %24 : vector<8x8x4xf32> to vector<64x4xf32>
    %c2 = arith.constant 2 : index
    %c0_16 = arith.constant 0 : index
    %c0_17 = arith.constant 0 : index
    %26 = vector.load %arg5[%c2, %c0_16, %c0_17] : memref<9x4x128xf32, #tpu.memory_space<vmem>>, vector<1x4x128xf32>
    %27 = vector.shape_cast %26 : vector<1x4x128xf32> to vector<4x128xf32>
    %cst_18 = arith.constant dense<0.000000e+00> : vector<64x128xf32>
    %28 = tpu.matmul %25, %27, %cst_18 {dimension_numbers = #tpu.dot_dimension_numbers<[1], [0], [0], [1], [0, 0, 1, 1], [], []>} : vector<64x4xf32>, vector<4x128xf32>, vector<64x128xf32> -> vector<64x128xf32>
    %29 = arith.addf %22, %28 : vector<64x128xf32>
    %30 = vector.extract_strided_slice %7 {offsets = [0, 0, 0, 0], sizes = [8, 1, 8, 4], strides = [1, 1, 1, 1]} : vector<8x2x9x4xf32> to vector<8x1x8x4xf32>
    %31 = vector.shape_cast %30 : vector<8x1x8x4xf32> to vector<8x8x4xf32>
    %32 = vector.shape_cast %31 : vector<8x8x4xf32> to vector<64x4xf32>
    %c3 = arith.constant 3 : index
    %c0_19 = arith.constant 0 : index
    %c0_20 = arith.constant 0 : index
    %33 = vector.load %arg5[%c3, %c0_19, %c0_20] : memref<9x4x128xf32, #tpu.memory_space<vmem>>, vector<1x4x128xf32>
    %34 = vector.shape_cast %33 : vector<1x4x128xf32> to vector<4x128xf32>
    %cst_21 = arith.constant dense<0.000000e+00> : vector<64x128xf32>
    %35 = tpu.matmul %32, %34, %cst_21 {dimension_numbers = #tpu.dot_dimension_numbers<[1], [0], [0], [1], [0, 0, 1, 1], [], []>} : vector<64x4xf32>, vector<4x128xf32>, vector<64x128xf32> -> vector<64x128xf32>
    %36 = arith.addf %29, %35 : vector<64x128xf32>
    %37 = vector.extract_strided_slice %7 {offsets = [0, 1, 0, 0], sizes = [8, 1, 8, 4], strides = [1, 1, 1, 1]} : vector<8x2x9x4xf32> to vector<8x1x8x4xf32>
    %38 = vector.shape_cast %37 : vector<8x1x8x4xf32> to vector<8x8x4xf32>
    %39 = vector.shape_cast %38 : vector<8x8x4xf32> to vector<64x4xf32>
    %c4 = arith.constant 4 : index
    %c0_22 = arith.constant 0 : index
    %c0_23 = arith.constant 0 : index
    %40 = vector.load %arg5[%c4, %c0_22, %c0_23] : memref<9x4x128xf32, #tpu.memory_space<vmem>>, vector<1x4x128xf32>
    %41 = vector.shape_cast %40 : vector<1x4x128xf32> to vector<4x128xf32>
    %cst_24 = arith.constant dense<0.000000e+00> : vector<64x128xf32>
    %42 = tpu.matmul %39, %41, %cst_24 {dimension_numbers = #tpu.dot_dimension_numbers<[1], [0], [0], [1], [0, 0, 1, 1], [], []>} : vector<64x4xf32>, vector<4x128xf32>, vector<64x128xf32> -> vector<64x128xf32>
    %43 = arith.addf %36, %42 : vector<64x128xf32>
    %44 = vector.extract_strided_slice %7 {offsets = [0, 0, 1, 0], sizes = [8, 1, 8, 4], strides = [1, 1, 1, 1]} : vector<8x2x9x4xf32> to vector<8x1x8x4xf32>
    %45 = vector.shape_cast %44 : vector<8x1x8x4xf32> to vector<8x8x4xf32>
    %46 = vector.shape_cast %45 : vector<8x8x4xf32> to vector<64x4xf32>
    %c5 = arith.constant 5 : index
    %c0_25 = arith.constant 0 : index
    %c0_26 = arith.constant 0 : index
    %47 = vector.load %arg5[%c5, %c0_25, %c0_26] : memref<9x4x128xf32, #tpu.memory_space<vmem>>, vector<1x4x128xf32>
    %48 = vector.shape_cast %47 : vector<1x4x128xf32> to vector<4x128xf32>
    %cst_27 = arith.constant dense<0.000000e+00> : vector<64x128xf32>
    %49 = tpu.matmul %46, %48, %cst_27 {dimension_numbers = #tpu.dot_dimension_numbers<[1], [0], [0], [1], [0, 0, 1, 1], [], []>} : vector<64x4xf32>, vector<4x128xf32>, vector<64x128xf32> -> vector<64x128xf32>
    %50 = arith.addf %43, %49 : vector<64x128xf32>
    %51 = vector.extract_strided_slice %5 {offsets = [0, 0, 0, 0], sizes = [8, 1, 8, 4], strides = [1, 1, 1, 1]} : vector<8x2x9x4xf32> to vector<8x1x8x4xf32>
    %52 = vector.shape_cast %51 : vector<8x1x8x4xf32> to vector<8x8x4xf32>
    %53 = vector.shape_cast %52 : vector<8x8x4xf32> to vector<64x4xf32>
    %c6 = arith.constant 6 : index
    %c0_28 = arith.constant 0 : index
    %c0_29 = arith.constant 0 : index
    %54 = vector.load %arg5[%c6, %c0_28, %c0_29] : memref<9x4x128xf32, #tpu.memory_space<vmem>>, vector<1x4x128xf32>
    %55 = vector.shape_cast %54 : vector<1x4x128xf32> to vector<4x128xf32>
    %cst_30 = arith.constant dense<0.000000e+00> : vector<64x128xf32>
    %56 = tpu.matmul %53, %55, %cst_30 {dimension_numbers = #tpu.dot_dimension_numbers<[1], [0], [0], [1], [0, 0, 1, 1], [], []>} : vector<64x4xf32>, vector<4x128xf32>, vector<64x128xf32> -> vector<64x128xf32>
    %57 = arith.addf %50, %56 : vector<64x128xf32>
    %58 = vector.extract_strided_slice %5 {offsets = [0, 1, 0, 0], sizes = [8, 1, 8, 4], strides = [1, 1, 1, 1]} : vector<8x2x9x4xf32> to vector<8x1x8x4xf32>
    %59 = vector.shape_cast %58 : vector<8x1x8x4xf32> to vector<8x8x4xf32>
    %60 = vector.shape_cast %59 : vector<8x8x4xf32> to vector<64x4xf32>
    %c7 = arith.constant 7 : index
    %c0_31 = arith.constant 0 : index
    %c0_32 = arith.constant 0 : index
    %61 = vector.load %arg5[%c7, %c0_31, %c0_32] : memref<9x4x128xf32, #tpu.memory_space<vmem>>, vector<1x4x128xf32>
    %62 = vector.shape_cast %61 : vector<1x4x128xf32> to vector<4x128xf32>
    %cst_33 = arith.constant dense<0.000000e+00> : vector<64x128xf32>
    %63 = tpu.matmul %60, %62, %cst_33 {dimension_numbers = #tpu.dot_dimension_numbers<[1], [0], [0], [1], [0, 0, 1, 1], [], []>} : vector<64x4xf32>, vector<4x128xf32>, vector<64x128xf32> -> vector<64x128xf32>
    %64 = arith.addf %57, %63 : vector<64x128xf32>
    %65 = vector.extract_strided_slice %5 {offsets = [0, 0, 1, 0], sizes = [8, 1, 8, 4], strides = [1, 1, 1, 1]} : vector<8x2x9x4xf32> to vector<8x1x8x4xf32>
    %66 = vector.shape_cast %65 : vector<8x1x8x4xf32> to vector<8x8x4xf32>
    %67 = vector.shape_cast %66 : vector<8x8x4xf32> to vector<64x4xf32>
    %c8 = arith.constant 8 : index
    %c0_34 = arith.constant 0 : index
    %c0_35 = arith.constant 0 : index
    %68 = vector.load %arg5[%c8, %c0_34, %c0_35] : memref<9x4x128xf32, #tpu.memory_space<vmem>>, vector<1x4x128xf32>
    %69 = vector.shape_cast %68 : vector<1x4x128xf32> to vector<4x128xf32>
    %cst_36 = arith.constant dense<0.000000e+00> : vector<64x128xf32>
    %70 = tpu.matmul %67, %69, %cst_36 {dimension_numbers = #tpu.dot_dimension_numbers<[1], [0], [0], [1], [0, 0, 1, 1], [], []>} : vector<64x4xf32>, vector<4x128xf32>, vector<64x128xf32> -> vector<64x128xf32>
    %71 = arith.addf %64, %70 : vector<64x128xf32>
    %c0_37 = arith.constant 0 : index
    %c0_38 = arith.constant 0 : index
    %72 = vector.load %arg6[%c0_37, %c0_38] : memref<1x128xf32, #tpu.memory_space<vmem>>, vector<1x128xf32>
    %73 = vector.broadcast %72 : vector<1x128xf32> to vector<64x128xf32>
    %74 = arith.addf %71, %73 : vector<64x128xf32>
    %75 = vector.shape_cast %74 : vector<64x128xf32> to vector<8x8x128xf32>
    %c0_39 = arith.constant 0 : index
    %c0_40 = arith.constant 0 : index
    %c0_41 = arith.constant 0 : index
    %c0_42 = arith.constant 0 : index
    %76 = vector.load %arg7[%c0_39, %c0_40, %c0_41, %c0_42] : memref<1x8x8x128xf32, #tpu.memory_space<vmem>>, vector<1x8x8x128xf32>
    %77 = vector.shape_cast %76 : vector<1x8x8x128xf32> to vector<8x8x128xf32>
    %78 = vector.shape_cast %75 : vector<8x8x128xf32> to vector<1x8x8x128xf32>
    tpu.vector_store %arg7[%c0_39, %c0_40, %c0_41, %c0_42], %78 {strides = array<i32>} : memref<1x8x8x128xf32, #tpu.memory_space<vmem>>, vector<1x8x8x128xf32>,
    return
  }
  func.func @transform_0(%arg0: i32, %arg1: i32, %arg2: i32) -> (i32, i32, i32, i32, i32) {
    %c0_i32 = arith.constant 0 : i32
    %c0_i32_0 = arith.constant 0 : i32
    %c0_i32_1 = arith.constant 0 : i32
    %c0_i32_2 = arith.constant 0 : i32
    return %arg0, %arg2, %c0_i32, %c0_i32_0, %c0_i32_1 : i32, i32, i32, i32, i32
  }
  func.func @transform_1(%arg0: i32, %arg1: i32, %arg2: i32) -> (i32, i32, i32, i32, i32) {
    %c1_i32 = arith.constant 1 : i32
    %0 = arith.addi %arg2, %c1_i32 : i32
    %c8_i32 = arith.constant 8 : i32
    %1 = arith.muli %0, %c8_i32 : i32
    %c0_i32 = arith.constant 0 : i32
    %c0_i32_0 = arith.constant 0 : i32
    %c0_i32_1 = arith.constant 0 : i32
    %c0_i32_2 = arith.constant 0 : i32
    return %arg0, %1, %c0_i32, %c0_i32_0, %c0_i32_1 : i32, i32, i32, i32, i32
  }
  func.func @transform_2(%arg0: i32, %arg1: i32, %arg2: i32) -> (i32, i32, i32) {
    %c0_i32 = arith.constant 0 : i32
    %c0_i32_0 = arith.constant 0 : i32
    %c0_i32_1 = arith.constant 0 : i32
    return %c0_i32, %c0_i32_0, %arg1 : i32, i32, i32
  }
  func.func @transform_3(%arg0: i32, %arg1: i32, %arg2: i32) -> (i32, i32) {
    %c0_i32 = arith.constant 0 : i32
    %c0_i32_0 = arith.constant 0 : i32
    return %c0_i32, %arg1 : i32, i32
  }
  func.func @transform_4(%arg0: i32, %arg1: i32, %arg2: i32) -> (i32, i32, i32, i32) {
    %c0_i32 = arith.constant 0 : i32
    %c0_i32_0 = arith.constant 0 : i32
    return %arg0, %arg2, %c0_i32, %arg1 : i32, i32, i32, i32
  }
}

</mosaic_0001>

<bundles_post_ra>
// kernel: downsample_with_conv.1
= control target key start
LH: loop header
LB: loop body
LE: loop exit
PB: predicated region body
PF: predicated region fallthrough
CT: control target
= control target key end

     0   :  { %s2232_s15 = smov 0   ;;  %s2234_s16 = smov 0   ;;  %s2575_s0 = inlined_call_operand.vmem [shape: f32[2,9,4,9,4], index: 0, kind: input, shape index: {}, may-alias: {0,1}]   ;;  %s2576_s1 = inlined_call_operand.vmem [shape: f32[2,9,4,9,4], index: 1, kind: input, shape index: {}, may-alias: {0,1}]   ;;  %s2577_s2 = inlined_call_operand.vmem [shape: f32[9,4,128], index: 2, kind: input, shape index: {}]   ;;  %s2578_s3 = inlined_call_operand.vmem [shape: f32[1,128], index: 3, kind: input, shape index: {}]   ;;  %s2579_s4 = inlined_call_operand.vmem [shape: f32[2,8,8,128], index: 4, kind: output, shape index: {}]  }
   0x1   :  { %s2236_s17 = smov 0  }
   0x2 LB: > { %s33_s18 = sadd.s32 1, %s2201_s16  ;;  %p1847_p0 = scmp.ge.s32.totalorder %s2205_s17, 1  ;;  %s2205_s17 = sphi %s2236_s17, %s14_s17   ;;  %s2201_s16 = sphi %s2234_s16, %s2581_s16   ;;  %s2197_s15 = sphi %s2232_s15, %s2580_s15  }
   0x3   : > { %p35_p1 = scmp.ge.s32.totalorder %s33_s18, 2  ;;  %p246_p2 = scmp.lt.s32.totalorder %s2205_s17, 3 }
   0x5   : > { %s2583_s18 = smov (%p35_p1, %s33_s18), 0  ;;  %p247_p3 = pnand %p1847_p0, %p246_p2 }
   0x6   : > { %p315_p4 = scmp.lt.s32.totalorder (!%p247_p3), %s2197_s15, 1 }
   0x7   : > { %250 = sbr.rel (%p247_p3) target bundleno = 290 (0x122), region = 36 }
   0xc   : > { %v1852_v0 = vld [vmem:[%s2577_s2 + $0x4] sm:$0xf]  ;;  %vm443_vm0 = vcmask 1043456   ;;  %v415_v1 = vld [vmem:[%s2577_s2] sm:$0xf]  ;;  %s2585_s15 = smov (!%p315_p4, %s2197_s15), 1 }
   0xd   : > { %2154 = vmatprep.subr.msk.mxu1 %vm443_vm0, %v1852_v0  ;;  %2028 = vmatprep.subr.msk.mxu0 %vm443_vm0, %v1852_v0  ;;  %v1871_v2 = vld [vmem:[%s2577_s2 + $0x8] sm:$0xf]  ;;  %s2156_s25 = smul.u32 576, %s2585_s15  ;;  %vm418_vm1 = vcmask 31744   ;;  %v1881_v6 = vld [vmem:[%s2577_s2 + $0xc] sm:$0xf] }
   0xe   : > { %2155 = vmatpush3.msk.msra.mxu1 %vm443_vm0, %v1852_v0  ;;  %2029 = vmatpush3.msk.msra.mxu0 %vm443_vm0, %v1852_v0  ;;  %v1891_v7 = vld [vmem:[%s2577_s2 + $0x10] sm:$0xf]  ;;  %vm692_vm2 = vcmask 1046528   ;;  %v1901_v40 = vld [vmem:[%s2577_s2 + $0x14] sm:$0xf]  ;;  %s1946_s23 = sshll.u32 %s2585_s15, 6 }
   0xf   : > { %2042 = vmatprep.subr.msk.mxu1 %vm443_vm0, %v415_v1  ;;  %2056 = vmatprep.subr.msk.mxu0 %vm443_vm0, %v1871_v2  ;;  %s2273_s28 = scalar_lea.vmem %s2575_s0, %s2156_s25  ;;  %v1911_v41 = vld [vmem:[%s2577_s2 + $0x18] sm:$0xf]  ;;  %v1921_v61 = vld [vmem:[%s2577_s2 + $0x1c] sm:$0xf]  ;;  %v1931_v62 = vld [vmem:[%s2577_s2 + $0x20] sm:$0xf] }
  0x10   : > { %v366_v3 = vld [vmem:[%s2273_s28 + $0x10] sm:$0xff]  ;;  %v364_v13 = vld [vmem:[%s2273_s28] sm:$0xff]  ;;  %v365_v15 = vld [vmem:[%s2273_s28 + $0x8] sm:$0x1]  ;;  %s1945_s19 = sadd.s32 512, %s2156_s25 }
  0x11   : > { %v2277_v4 = vld [vmem:[%s2273_s28 + $0x110] sm:$0xff]  ;;  %2030 = vmatprep.mubr.msk.f32.mxu0 %vm418_vm1, %v366_v3  ;;  %v693_v14 = vrot.slane %v364_v13, 1  ;;  %v2315_v16 = vld [vmem:[%s2273_s28 + $0x40] sm:$0xff]  ;;  %v371_v17 = vld [vmem:[%s2273_s28 + $0x48] sm:$0x1]  ;;  %v694_v18 = vrot.slane %v365_v15, 1  ;;  %s341_s22 = scalar_lea.vmem %s2576_s1, %s1945_s19 }
  0x12   : > { %v2280_v5 = vld [vmem:[%s2273_s28 + $0x50] sm:$0xff]  ;;  %2036 = vmatprep.mubr.msk.f32.mxu1 %vm418_vm1, %v2277_v4  ;;  %v696_v19 = vrot.slane %v2315_v16, 1  ;;  %v697_v20 = vrot.slane %v371_v17, 1  ;;  %v2324_v21 = vld [vmem:[%s2273_s28 + $0x80] sm:$0xff]  ;;  %v377_v22 = vld [vmem:[%s2273_s28 + $0x88] sm:$0x1] }
  0x13   : > { %v2292_v8 = vld [vmem:[%s2273_s28 + $0x150] sm:$0xff]  ;;  %2031 = vmatmul.mubr.msk.f32.vlgmr.msra.gmra.mxu0 %vm418_vm1, %v2280_v5  ;;  %v699_v23 = vrot.slane %v2324_v21, 1  ;;  %v700_v24 = vrot.slane %v377_v22, 1  ;;  %v2331_v25 = vld [vmem:[%s2273_s28 + $0xc0] sm:$0xff]  ;;  %v383_v26 = vld [vmem:[%s2273_s28 + $0xc8] sm:$0x1]  ;;  %v695_v28 = vsel %vm692_vm2, %v693_v14, %v694_v18 }
  0x14   : > { %v2295_v9 = vld [vmem:[%s2273_s28 + $0x90] sm:$0xff]  ;;  %2037 = vmatmul.mubr.msk.f32.vlgmr.msra.gmra.mxu1 %vm418_vm1, %v2292_v8  ;;  %2057 = vmatpush3.msk.msra.mxu0 %vm443_vm0, %v1871_v2  ;;  %v2335_v27 = vld [vmem:[%s2273_s28 + $0x100] sm:$0xff]  ;;  %v389_v29 = vld [vmem:[%s2273_s28 + $0x108] sm:$0x1]  ;;  %v2346_v30 = vsel %vm692_vm2, %v696_v19, %v697_v20  ;;  %v702_v31 = vrot.slane %v2331_v25, 1  ;;  %v703_v32 = vrot.slane %v383_v26, 1 }
  0x15   : > { %v2298_v10 = vld [vmem:[%s2273_s28 + $0x190] sm:$0xff]  ;;  %2043 = vmatpush3.msk.msra.mxu1 %vm443_vm0, %v415_v1  ;;  %2033 = vmatprep.mubr.msk.f32.mxu0 %vm418_vm1, %v2295_v9  ;;  %v705_v33 = vrot.slane %v2335_v27, 1  ;;  %v706_v34 = vrot.slane %v389_v29, 1  ;;  %v2351_v35 = vld [vmem:[%s2273_s28 + $0x140] sm:$0xff]  ;;  %v395_v36 = vld [vmem:[%s2273_s28 + $0x148] sm:$0x1]  ;;  %v2355_v37 = vsel %vm692_vm2, %v699_v23, %v700_v24 }
  0x16   : > { %v2305_v11 = vld [vmem:[%s2273_s28 + $0xd0] sm:$0xff]  ;;  %2039 = vmatprep.mubr.msk.f32.mxu1 %vm418_vm1, %v2298_v10  ;;  %2070 = vmatprep.subr.msk.mxu1 %vm443_vm0, %v1881_v6  ;;  %v2358_v38 = vld [vmem:[%s2273_s28 + $0x180] sm:$0xff]  ;;  %v401_v39 = vld [vmem:[%s2273_s28 + $0x188] sm:$0x1]  ;;  %v2374_v42 = vsel %vm692_vm2, %v702_v31, %v703_v32  ;;  %v708_v43 = vrot.slane %v2351_v35, 1  ;;  %v709_v44 = vrot.slane %v395_v36, 1 }
  0x17   : > { %v2308_v12 = vld [vmem:[%s2273_s28 + $0x1d0] sm:$0xff]  ;;  %2084 = vmatprep.subr.msk.mxu0 %vm443_vm0, %v1891_v7  ;;  %2034 = vmatmul.mubr.msk.f32.gmra.mxu0 %vm418_vm1, %v2305_v11  ;;  %v2382_v45 = vsel %vm692_vm2, %v705_v33, %v706_v34  ;;  %v711_v46 = vrot.slane %v2358_v38, 1  ;;  %v712_v47 = vrot.slane %v401_v39, 1  ;;  %v2386_v48 = vld [vmem:[%s2273_s28 + $0x1c0] sm:$0xff]  ;;  %v407_v49 = vld [vmem:[%s2273_s28 + $0x1c8] sm:$0x1] }
  0x18   : > { %2040 = vmatmul.mubr.msk.f32.gmra.mxu1 %vm418_vm1, %v2308_v12  ;;  %2058 = vmatprep.mubr.msk.f32.mxu0 %vm418_vm1, %v695_v28  ;;  %v2400_v50 = vsel %vm692_vm2, %v708_v43, %v709_v44  ;;  %v714_v51 = vrot.slane %v2386_v48, 1  ;;  %v715_v52 = vrot.slane %v407_v49, 1  ;;  %v367_v55 = vld [vmem:[%s2273_s28 + $0x20] sm:$0xff]  ;;  %v369_v56 = vld [vmem:[%s2273_s28 + $0x30] sm:$0xff]  ;;  %v368_v3 = vld [vmem:[%s2273_s28 + $0x28] sm:$0x1] }
  0x19   : > { %2044 = vmatprep.mubr.msk.f32.mxu1 %vm418_vm1, %v364_v13  ;;  %v2404_v53 = vsel %vm692_vm2, %v711_v46, %v712_v47  ;;  %v373_v57 = vld [vmem:[%s2273_s28 + $0x60] sm:$0xff]  ;;  %v375_v58 = vld [vmem:[%s2273_s28 + $0x70] sm:$0xff]  ;;  %v1143_v13 = vrot.slane %v367_v55, 1  ;;  %v1144_v17 = vrot.slane %v368_v3, 1  ;;  %v374_v18 = vld [vmem:[%s2273_s28 + $0x68] sm:$0x1] }
  0x1a   : > { %v2415_v54 = vsel %vm692_vm2, %v714_v51, %v715_v52  ;;  %v379_v59 = vld [vmem:[%s2273_s28 + $0xa0] sm:$0xff]  ;;  %v381_v60 = vld [vmem:[%s2273_s28 + $0xb0] sm:$0xff]  ;;  %v380_v19 = vld [vmem:[%s2273_s28 + $0xa8] sm:$0x1]  ;;  %v1146_v20 = vrot.slane %v373_v57, 1  ;;  %v1147_v24 = vrot.slane %v374_v18, 1 }
  0x1b   : > { %2059 = vmatmul.mubr.msk.f32.vlgmr.msra.gmra.mxu0 %vm418_vm1, %v2346_v30  ;;  %v385_v63 = vld [vmem:[%s2273_s28 + $0xe0] sm:$0xff]  ;;  %v387_v0 = vld [vmem:[%s2273_s28 + $0xf0] sm:$0xff]  ;;  %v1145_v26 = vsel %vm692_vm2, %v1143_v13, %v1144_v17  ;;  %v386_v28 = vld [vmem:[%s2273_s28 + $0xe8] sm:$0x1]  ;;  %v1149_v29 = vrot.slane %v379_v59, 1  ;;  %v1150_v31 = vrot.slane %v380_v19, 1 }
  0x1c   : > { %2045 = vmatmul.mubr.msk.f32.vlgmr.msra.gmra.mxu1 %vm418_vm1, %v2315_v16  ;;  %2085 = vmatpush3.msk.msra.mxu0 %vm443_vm0, %v1891_v7  ;;  %v391_v1 = vld [vmem:[%s2273_s28 + $0x120] sm:$0xff]  ;;  %v393_v2 = vld [vmem:[%s2273_s28 + $0x130] sm:$0xff]  ;;  %v392_v32 = vld [vmem:[%s2273_s28 + $0x128] sm:$0x1]  ;;  %v1152_v33 = vrot.slane %v385_v63, 1  ;;  %v1148_v34 = vsel %vm692_vm2, %v1146_v20, %v1147_v24  ;;  %v1153_v36 = vrot.slane %v386_v28, 1 }
  0x1d   : > { %2071 = vmatpush3.msk.msra.mxu1 %vm443_vm0, %v1881_v6  ;;  %2047 = vmatprep.mubr.msk.f32.mxu1 %vm418_vm1, %v2324_v21  ;;  %v397_v6 = vld [vmem:[%s2273_s28 + $0x160] sm:$0xff]  ;;  %v399_v7 = vld [vmem:[%s2273_s28 + $0x170] sm:$0xff]  ;;  %v1155_v39 = vrot.slane %v391_v1, 1  ;;  %v1151_v43 = vsel %vm692_vm2, %v1149_v29, %v1150_v31  ;;  %v404_v44 = vld [vmem:[%s2273_s28 + $0x1a8] sm:$0x1] }
  0x1e   : > { %2061 = vmatprep.mubr.msk.f32.mxu0 %vm418_vm1, %v2355_v37  ;;  %2098 = vmatprep.subr.msk.mxu1 %vm443_vm0, %v1901_v40  ;;  %v403_v14 = vld [vmem:[%s2273_s28 + $0x1a0] sm:$0xff]  ;;  %v405_v15 = vld [vmem:[%s2273_s28 + $0x1b0] sm:$0xff]  ;;  %v1158_v46 = vrot.slane %v397_v6, 1  ;;  %v1162_v52 = vrot.slane %v404_v44, 1 }
  0x1f   : > { %2112 = vmatprep.subr.msk.mxu0 %vm443_vm0, %v1911_v41  ;;  %2062 = vmatmul.mubr.msk.f32.gmra.mxu0 %vm418_vm1, %v2374_v42  ;;  %v409_v22 = vld [vmem:[%s2273_s28 + $0x1e0] sm:$0xff]  ;;  %v411_v23 = vld [vmem:[%s2273_s28 + $0x1f0] sm:$0xff]  ;;  %v1161_v49 = vrot.slane %v403_v14, 1 }
  0x20   : > { %2048 = vmatmul.mubr.msk.f32.gmra.mxu1 %vm418_vm1, %v2331_v25  ;;  %2064 = vmatprep.mubr.msk.f32.mxu0 %vm418_vm1, %v2382_v45 }
  0x21   : > { %2050 = vmatprep.mubr.msk.f32.mxu1 %vm418_vm1, %v2335_v27 }
  0x23   : > { %2065 = vmatmul.mubr.msk.f32.gmra.mxu0 %vm418_vm1, %v2400_v50 }
  0x24   : > { %2051 = vmatmul.mubr.msk.f32.gmra.mxu1 %vm418_vm1, %v2351_v35  ;;  %2067 = vmatprep.mubr.msk.f32.mxu0 %vm418_vm1, %v2404_v53 }
  0x25   : > { %2053 = vmatprep.mubr.msk.f32.mxu1 %vm418_vm1, %v2358_v38 }
  0x27   : > { %2068 = vmatmul.mubr.msk.f32.gmra.mxu0 %vm418_vm1, %v2415_v54 }
  0x28   : > { %2054 = vmatmul.mubr.msk.f32.gmra.mxu1 %vm418_vm1, %v2386_v48  ;;  %2086 = vmatprep.mubr.msk.f32.mxu0 %vm418_vm1, %v369_v56 }
  0x29   : > { %2072 = vmatprep.mubr.msk.f32.mxu1 %vm418_vm1, %v367_v55  ;;  %v410_v55 = vld [vmem:[%s2273_s28 + $0x1e8] sm:$0x1] }
  0x2b   : > { %2087 = vmatmul.mubr.msk.f32.vlgmr.msra.gmra.mxu0 %vm418_vm1, %v375_v58 }
  0x2c   : > { %2073 = vmatmul.mubr.msk.f32.vlgmr.msra.gmra.mxu1 %vm418_vm1, %v373_v57  ;;  %2113 = vmatpush3.msk.msra.mxu0 %vm443_vm0, %v1911_v41  ;;  %v398_v41 = vld [vmem:[%s2273_s28 + $0x168] sm:$0x1]  ;;  %v1163_v57 = vsel %vm692_vm2, %v1161_v49, %v1162_v52  ;;  %s2555_s28 = scalar_lea.vmem %s2579_s4, %s1946_s23 }
  0x2d   : > { %2099 = vmatpush3.msk.msra.mxu1 %vm443_vm0, %v1901_v40  ;;  %2075 = vmatprep.mubr.msk.f32.mxu1 %vm418_vm1, %v379_v59  ;;  %v1156_v40 = vrot.slane %v392_v32, 1  ;;  %v1159_v47 = vrot.slane %v398_v41, 1 }
  0x2e   : > { %2089 = vmatprep.mubr.msk.f32.mxu0 %vm418_vm1, %v381_v60  ;;  %2126 = vmatprep.subr.msk.mxu1 %vm443_vm0, %v1921_v61 }
  0x2f   : > { %2140 = vmatprep.subr.msk.mxu0 %vm443_vm0, %v1931_v62  ;;  %2090 = vmatmul.mubr.msk.f32.gmra.mxu0 %vm418_vm1, %v387_v0  ;;  %v1157_v51 = vsel %vm692_vm2, %v1155_v39, %v1156_v40  ;;  %v1160_v56 = vsel %vm692_vm2, %v1158_v46, %v1159_v47 }
  0x30   : > { %2076 = vmatmul.mubr.msk.f32.gmra.mxu1 %vm418_vm1, %v385_v63  ;;  %2092 = vmatprep.mubr.msk.f32.mxu0 %vm418_vm1, %v393_v2 }
  0x31   : > { %2078 = vmatprep.mubr.msk.f32.mxu1 %vm418_vm1, %v391_v1 }
  0x33   : > { %2093 = vmatmul.mubr.msk.f32.gmra.mxu0 %vm418_vm1, %v399_v7 }
  0x34   : > { %2079 = vmatmul.mubr.msk.f32.gmra.mxu1 %vm418_vm1, %v397_v6  ;;  %2095 = vmatprep.mubr.msk.f32.mxu0 %vm418_vm1, %v405_v15 }
  0x35   : > { %2081 = vmatprep.mubr.msk.f32.mxu1 %vm418_vm1, %v403_v14 }
  0x37   : > { %2096 = vmatmul.mubr.msk.f32.gmra.mxu0 %vm418_vm1, %v411_v23 }
  0x38   : > { %2082 = vmatmul.mubr.msk.f32.gmra.mxu1 %vm418_vm1, %v409_v22  ;;  %2114 = vmatprep.mubr.msk.f32.mxu0 %vm418_vm1, %v2315_v16  ;;  %v1154_v16 = vsel %vm692_vm2, %v1152_v33, %v1153_v36 }
  0x39   : > { %2100 = vmatprep.mubr.msk.f32.mxu1 %vm418_vm1, %v1145_v26 }
  0x3b   : > { %2115 = vmatmul.mubr.msk.f32.vlgmr.msra.gmra.mxu0 %vm418_vm1, %v2324_v21  ;;  %v1164_v21 = vrot.slane %v409_v22, 1 }
  0x3c   : > { %2101 = vmatmul.mubr.msk.f32.vlgmr.msra.gmra.mxu1 %vm418_vm1, %v1148_v34  ;;  %2141 = vmatpush3.msk.msra.mxu0 %vm443_vm0, %v1931_v62 }
  0x3d   : > { %2127 = vmatpush3.msk.msra.mxu1 %vm443_vm0, %v1921_v61  ;;  %2103 = vmatprep.mubr.msk.f32.mxu1 %vm418_vm1, %v1151_v43 }
  0x3e   : > { %2117 = vmatprep.mubr.msk.f32.mxu0 %vm418_vm1, %v2331_v25  ;;  %v1165_v25 = vrot.slane %v410_v55, 1 }
  0x3f   : > { %2118 = vmatmul.mubr.msk.f32.gmra.mxu0 %vm418_vm1, %v2335_v27 }
  0x40   : > { %2104 = vmatmul.mubr.msk.f32.gmra.mxu1 %vm418_vm1, %v1154_v16  ;;  %2120 = vmatprep.mubr.msk.f32.mxu0 %vm418_vm1, %v2351_v35  ;;  %v1166_v27 = vsel %vm692_vm2, %v1164_v21, %v1165_v25  ;;  %v412_v35 = vld [vmem:[%s341_s22] sm:$0xff] }
  0x41   : > { %2106 = vmatprep.mubr.msk.f32.mxu1 %vm418_vm1, %v1157_v51 }
  0x43   : > { %2121 = vmatmul.mubr.msk.f32.gmra.mxu0 %vm418_vm1, %v2358_v38  ;;  %v413_v38 = vld [vmem:[%s341_s22 + $0x8] sm:$0x1] }
  0x44   : > { %2107 = vmatmul.mubr.msk.f32.gmra.mxu1 %vm418_vm1, %v1160_v56  ;;  %2123 = vmatprep.mubr.msk.f32.mxu0 %vm418_vm1, %v2386_v48 }
  0x45   : > { %2109 = vmatprep.mubr.msk.f32.mxu1 %vm418_vm1, %v1163_v57 }
  0x47   : > { %2124 = vmatmul.mubr.msk.f32.gmra.mxu0 %vm418_vm1, %v412_v35 }
  0x48   : > { %2110 = vmatmul.mubr.msk.f32.gmra.mxu1 %vm418_vm1, %v1166_v27  ;;  %2142 = vmatprep.mubr.msk.f32.mxu0 %vm418_vm1, %v2346_v30 }
  0x49   : > { %2128 = vmatprep.mubr.msk.f32.mxu1 %vm418_vm1, %v2280_v5  ;;  %v1544_v5 = vrot.slane %v412_v35, 1 }
  0x4b   : > { %2143 = vmatmul.mubr.msk.f32.vlgmr.msra.gmra.mxu0 %vm418_vm1, %v2355_v37 }
  0x4c   : > { %2129 = vmatmul.mubr.msk.f32.vlgmr.msra.gmra.mxu1 %vm418_vm1, %v2295_v9  ;;  %2145 = vmatprep.mubr.msk.f32.mxu0 %vm418_vm1, %v2374_v42  ;;  %v1545_v9 = vrot.slane %v413_v38, 1 }
  0x4d   : > { %2131 = vmatprep.mubr.msk.f32.mxu1 %vm418_vm1, %v2305_v11 }
  0x4e   : > { %v1546_v11 = vsel %vm692_vm2, %v1544_v5, %v1545_v9 }
  0x4f   : > { %2146 = vmatmul.mubr.msk.f32.gmra.mxu0 %vm418_vm1, %v2382_v45 }
  0x50   : > { %2132 = vmatmul.mubr.msk.f32.gmra.mxu1 %vm418_vm1, %v2277_v4  ;;  %2148 = vmatprep.mubr.msk.f32.mxu0 %vm418_vm1, %v2400_v50  ;;  %v414_v4 = vld [vmem:[%s341_s22 + $0x10] sm:$0xff] }
  0x51   : > { %2134 = vmatprep.mubr.msk.f32.mxu1 %vm418_vm1, %v2292_v8 }
  0x53   : > { %2149 = vmatmul.mubr.msk.f32.gmra.mxu0 %vm418_vm1, %v2404_v53 }
  0x54   : > { %2135 = vmatmul.mubr.msk.f32.gmra.mxu1 %vm418_vm1, %v2298_v10  ;;  %2151 = vmatprep.mubr.msk.f32.mxu0 %vm418_vm1, %v2415_v54 }
  0x55   : > { %2137 = vmatprep.mubr.msk.f32.mxu1 %vm418_vm1, %v2308_v12 }
  0x57   : > { %2152 = vmatmul.mubr.msk.f32.gmra.mxu0 %vm418_vm1, %v1546_v11 }
  0x58   : > { %2138 = vmatmul.mubr.msk.f32.gmra.mxu1 %vm418_vm1, %v414_v4 }
  0xd3   : > { %v2032_v8 = vpop.f32.mrf.mxu0 }
  0xd4   : > { %v2038_v30 = vpop.f32.mrf.mxu1 }
  0xd5   : > { %v513_v37 = vpop.f32.mrf.mxu0 }
  0xd6   : > { %v533_v10 = vpop.f32.mrf.mxu1 }
  0xd7   : > { %v2035_v42 = vpop.f32.mrf.mxu0 }
  0xd8   : > { %v2041_v45 = vpop.f32.mrf.mxu1 }
  0xd9   : > { %v523_v48 = vpop.f32.mrf.mxu0 }
  0xda   : > { %v2540_v50 = vpop.f32.mrf.mxu1 }
  0xdb   : > { %v2060_v53 = vpop.f32.mrf.mxu0 }
  0xdc   : > { %v2046_v12 = vpop.f32.mrf.mxu1 }
  0xdd   : > { %v804_v54 = vpop.f32.mrf.mxu0  ;;  %v651_v36 = vadd.f32 %v2046_v12, %v2032_v8 }
  0xde   : > { %v645_v58 = vpop.f32.mrf.mxu1 }
  0xdf   : > { %v2063_v60 = vpop.f32.mrf.mxu0  ;;  %v646_v41 = vadd.f32 %v645_v58, %v513_v37  ;;  %v844_v46 = vadd.f32 %v2060_v53, %v651_v36 }
  0xe0   : > { %v2049_v59 = vpop.f32.mrf.mxu1 }
  0xe1   : > { %v814_v62 = vpop.f32.mrf.mxu0  ;;  %v661_v16 = vadd.f32 %v2049_v59, %v2035_v42  ;;  %v843_v51 = vadd.f32 %v804_v54, %v646_v41 }
  0xe2   : > { %v655_v61 = vpop.f32.mrf.mxu1 }
  0xe3   : > { %v2066_v0 = vpop.f32.mrf.mxu0  ;;  %v656_v52 = vadd.f32 %v655_v61, %v523_v48  ;;  %v846_v57 = vadd.f32 %v2063_v60, %v661_v16 }
  0xe4   : > { %v2052_v63 = vpop.f32.mrf.mxu1 }
  0xe5   : > { %v824_v2 = vpop.f32.mrf.mxu0  ;;  %v671_v21 = vadd.f32 %v2052_v63, %v2038_v30  ;;  %v845_v9 = vadd.f32 %v814_v62, %v656_v52 }
  0xe6   : > { %v665_v1 = vpop.f32.mrf.mxu1 }
  0xe7   : > { %v2069_v6 = vpop.f32.mrf.mxu0  ;;  %v666_v35 = vadd.f32 %v665_v1, %v533_v10  ;;  %v848_v8 = vadd.f32 %v2066_v0, %v671_v21 }
  0xe8   : > { %v2055_v3 = vpop.f32.mrf.mxu1 }
  0xe9   : > { %v834_v13 = vpop.f32.mrf.mxu0  ;;  %v681_v37 = vadd.f32 %v2055_v3, %v2041_v45  ;;  %v847_v48 = vadd.f32 %v824_v2, %v666_v35 }
  0xea   : > { %v675_v7 = vpop.f32.mrf.mxu1 }
  0xeb   : > { %v2088_v15 = vpop.f32.mrf.mxu0  ;;  %v676_v30 = vadd.f32 %v675_v7, %v2540_v50  ;;  %v850_v1 = vadd.f32 %v2069_v6, %v681_v37  ;;  %v1941_v6 = vld [vmem:[%s2578_s3] ss:$0 sm:$0xff] }
  0xec   : > { %v2074_v14 = vpop.f32.mrf.mxu1 }
  0xed   : > { %v1088_v18 = vpop.f32.mrf.mxu0  ;;  %v986_v55 = vadd.f32 %v2074_v14, %v844_v46 }
  0xee   : > { %v946_v17 = vpop.f32.mrf.mxu1 }
  0xef   : > { %v2091_v20 = vpop.f32.mrf.mxu0  ;;  %v985_v27 = vadd.f32 %v946_v17, %v843_v51  ;;  %v1128_v4 = vadd.f32 %v2088_v15, %v986_v55  ;;  %v849_v17 = vadd.f32 %v834_v13, %v676_v30 }
  0xf0   : > { %v2077_v19 = vpop.f32.mrf.mxu1 }
  0xf1   : > { %v1098_v23 = vpop.f32.mrf.mxu0  ;;  %v988_v11 = vadd.f32 %v2077_v19, %v846_v57  ;;  %v1127_v53 = vadd.f32 %v1088_v18, %v985_v27 }
  0xf2   : > { %v956_v22 = vpop.f32.mrf.mxu1 }
  0xf3   : > { %v2094_v26 = vpop.f32.mrf.mxu0  ;;  %v987_v58 = vadd.f32 %v956_v22, %v845_v9  ;;  %v1130_v63 = vadd.f32 %v2091_v20, %v988_v11 }
  0xf4   : > { %v2080_v24 = vpop.f32.mrf.mxu1 }
  0xf5   : > { %v1108_v29 = vpop.f32.mrf.mxu0  ;;  %v990_v59 = vadd.f32 %v2080_v24, %v848_v8  ;;  %v1129_v0 = vadd.f32 %v1098_v23, %v987_v58 }
  0xf6   : > { %v966_v28 = vpop.f32.mrf.mxu1 }
  0xf7   : > { %v2542_v32 = vpop.f32.mrf.mxu0  ;;  %v989_v62 = vadd.f32 %v966_v28, %v847_v48  ;;  %v1132_v18 = vadd.f32 %v2094_v26, %v990_v59 }
  0xf8   : > { %v2083_v31 = vpop.f32.mrf.mxu1 }
  0xf9   : > { %v2544_v34 = vpop.f32.mrf.mxu0  ;;  %v992_v19 = vadd.f32 %v2083_v31, %v850_v1  ;;  %v1131_v24 = vadd.f32 %v1108_v29, %v989_v62 }
  0xfa   : > { %v976_v33 = vpop.f32.mrf.mxu1 }
  0xfb   : > { %v2116_v40 = vpop.f32.mrf.mxu0  ;;  %v991_v20 = vadd.f32 %v976_v33, %v849_v17  ;;  %v1134_v26 = vadd.f32 %v2542_v32, %v992_v19 }
  0xfc   : > { %v2102_v39 = vpop.f32.mrf.mxu1 }
  0xfd   : > { %v1375_v44 = vpop.f32.mrf.mxu0  ;;  %v1294_v54 = vadd.f32 %v2102_v39, %v1128_v4 }
  0xfe   : > { %v1254_v43 = vpop.f32.mrf.mxu1 }
  0xff   : > { %v2119_v49 = vpop.f32.mrf.mxu0  ;;  %v1293_v10 = vadd.f32 %v1254_v43, %v1127_v53  ;;  %v1415_v45 = vadd.f32 %v2116_v40, %v1294_v54 }
 0x100   : > { %v2105_v47 = vpop.f32.mrf.mxu1 }
 0x101   : > { %v1385_v25 = vpop.f32.mrf.mxu0  ;;  %v1296_v3 = vadd.f32 %v2105_v47, %v1130_v63  ;;  %v1414_v36 = vadd.f32 %v1375_v44, %v1293_v10  ;;  %v1133_v47 = vadd.f32 %v2544_v34, %v991_v20 }
 0x102   : > { %v1264_v56 = vpop.f32.mrf.mxu1 }
 0x103   : > { %v2122_v5 = vpop.f32.mrf.mxu0  ;;  %v1295_v50 = vadd.f32 %v1264_v56, %v1129_v0  ;;  %v1417_v40 = vadd.f32 %v2119_v49, %v1296_v3 }
 0x104   : > { %v2108_v38 = vpop.f32.mrf.mxu1 }
 0x105   : > { %v1395_v42 = vpop.f32.mrf.mxu0  ;;  %v1298_v39 = vadd.f32 %v2108_v38, %v1132_v18  ;;  %v1416_v43 = vadd.f32 %v1385_v25, %v1295_v50 }
 0x106   : > { %v1274_v12 = vpop.f32.mrf.mxu1 }
 0x107   : > { %v2125_v60 = vpop.f32.mrf.mxu0  ;;  %v1297_v31 = vadd.f32 %v1274_v12, %v1131_v24  ;;  %v1419_v49 = vadd.f32 %v2122_v5, %v1298_v39 }
 0x108   : > { %v2111_v61 = vpop.f32.mrf.mxu1 }
 0x109   : > { %v1405_v15 = vpop.f32.mrf.mxu0  ;;  %v1300_v32 = vadd.f32 %v2111_v61, %v1134_v26  ;;  %v1418_v57 = vadd.f32 %v1395_v42, %v1297_v31 }
 0x10a   : > { %v1284_v14 = vpop.f32.mrf.mxu1 }
 0x10b   : > { %v2144_v2 = vpop.f32.mrf.mxu0  ;;  %v1299_v25 = vadd.f32 %v1284_v14, %v1133_v47  ;;  %v1421_v11 = vadd.f32 %v2125_v60, %v1300_v32 }
 0x10c   : > { %v2130_v22 = vpop.f32.mrf.mxu1 }
 0x10d   : > { %v1536_v7 = vadd.f32 %v2130_v22, %v1415_v45  ;;  %v1620_v23 = vpop.f32.mrf.mxu0  ;;  %v1420_v58 = vadd.f32 %v1405_v15, %v1299_v25 }
 0x10e   : > { %v1496_v28 = vpop.f32.mrf.mxu1 }
 0x10f   : > { %v1660_v41 = vadd.f32 %v2144_v2, %v1536_v7  ;;  %v1535_v13 = vadd.f32 %v1496_v28, %v1414_v36  ;;  %v2147_v33 = vpop.f32.mrf.mxu0 }
 0x110   : > { %v2133_v29 = vpop.f32.mrf.mxu1 }
 0x111   : > { %v1675_v44 = vadd.f32 %v1941_v6, %v1660_v41  ;;  %v1659_v46 = vadd.f32 %v1620_v23, %v1535_v13  ;;  %v1538_v16 = vadd.f32 %v2133_v29, %v1417_v40  ;;  %v1630_v52 = vpop.f32.mrf.mxu0 }
 0x112   : > { %v1506_v51 = vpop.f32.mrf.mxu1 }
 0x113   : > { %1683 = vst [vmem:[%s2555_s28 + $0x8] sm:$0xff] %v1675_v44  ;;  %v1674_v55 = vadd.f32 %v1941_v6, %v1659_v46  ;;  %v1662_v21 = vadd.f32 %v2147_v33, %v1538_v16  ;;  %v1537_v56 = vadd.f32 %v1506_v51, %v1416_v43  ;;  %v2150_v35 = vpop.f32.mrf.mxu0 }
 0x114   : > { %v2136_v27 = vpop.f32.mrf.mxu1 }
 0x115   : > { %1682 = vst [vmem:[%s2555_s28] sm:$0xff] %v1674_v55  ;;  %v1677_v38 = vadd.f32 %v1941_v6, %v1662_v21  ;;  %v1661_v9 = vadd.f32 %v1630_v52, %v1537_v56  ;;  %v1540_v4 = vadd.f32 %v2136_v27, %v1419_v49  ;;  %v1640_v5 = vpop.f32.mrf.mxu0 }
 0x116   : > { %v1516_v34 = vpop.f32.mrf.mxu1 }
 0x117   : > { %1685 = vst [vmem:[%s2555_s28 + $0x18] sm:$0xff] %v1677_v38  ;;  %v1676_v8 = vadd.f32 %v1941_v6, %v1661_v9  ;;  %v1664_v37 = vadd.f32 %v2150_v35, %v1540_v4  ;;  %v1539_v12 = vadd.f32 %v1516_v34, %v1418_v57  ;;  %v2153_v42 = vpop.f32.mrf.mxu0 }
 0x118   : > { %v2139_v53 = vpop.f32.mrf.mxu1 }
 0x119   : > { %1684 = vst [vmem:[%s2555_s28 + $0x10] sm:$0xff] %v1676_v8  ;;  %v1679_v54 = vadd.f32 %v1941_v6, %v1664_v37  ;;  %v1663_v48 = vadd.f32 %v1640_v5, %v1539_v12  ;;  %v1542_v30 = vadd.f32 %v2139_v53, %v1421_v11  ;;  %v1650_v60 = vpop.f32.mrf.mxu0 }
 0x11a   : > { %v1526_v59 = vpop.f32.mrf.mxu1 }
 0x11b   : > { %1687 = vst [vmem:[%s2555_s28 + $0x28] sm:$0xff] %v1679_v54  ;;  %v1678_v61 = vadd.f32 %v1941_v6, %v1663_v48  ;;  %v1666_v63 = vadd.f32 %v2153_v42, %v1542_v30  ;;  %v1541_v10 = vadd.f32 %v1526_v59, %v1420_v58 }
 0x11d   : > { %1686 = vst [vmem:[%s2555_s28 + $0x20] sm:$0xff] %v1678_v61  ;;  %v1681_v1 = vadd.f32 %v1941_v6, %v1666_v63  ;;  %v1665_v62 = vadd.f32 %v1650_v60, %v1541_v10 }
 0x11f   : > { %1689 = vst [vmem:[%s2555_s28 + $0x38] sm:$0xff] %v1681_v1  ;;  %v1680_v14 = vadd.f32 %v1941_v6, %v1665_v62 }
 0x121   : > { %1688 = vst [vmem:[%s2555_s28 + $0x30] sm:$0xff] %v1680_v14 }
 0x122 PF: > { %s14_s17 = sadd.s32 1, %s2205_s17   ;;  %s2580_s15 = smov %s2201_s16 }
 0x123   : > { %p11_p5 = scmp.ge.s32.totalorder %s14_s17, 4   ;;  %s2581_s16 = smov %s2583_s18 }
 0x125   :  { %13 = sbr.rel (!%p11_p5) target bundleno = 2 (0x2), region = 83 }

</bundles_post_ra>
